<compile_context>
chip_gen: v5e
topology: v5e:2x2
jax: 0.10.0
libtpu: 0.0.40
codegen_flags: <defaults>
</compile_context>

<pallas_src>
import jax
import jax.numpy as jnp
from jax import lax
from jax.experimental import pallas as pl
from jax.experimental.pallas import tpu as pltpu

BETA = 8.0          # Hopfield inverse temperature
TAU = 0.1           # CLOOB_Loss.__init__: self.tau = 1/10
INV_TAU = 1.0 / TAU


# ----------------------------- kernel helpers --------------------------------

def _gram(a, b):
    """a @ b.T without materializing a transpose ('NT' MXU contraction)."""
    return lax.dot_general(a, b, (((1,), (1,)), ((), ())),
                           preferred_element_type=jnp.float32)


def _inv(v, approx):
    # approx=True -> EUP vrcp (off the VALU); approx=False -> exact divide.
    return pl.reciprocal(v, approx=True) if approx else 1.0 / v


def _inv_sqrt(v, approx):
    return lax.rsqrt(v) if approx else 1.0 / jnp.sqrt(v)


def _l2_normalize_rows(out, approx):
    # F.normalize(out, dim=1): out / max(||out||, 1e-12) == out * rsqrt(max(ss, 1e-24))
    ss = jnp.sum(out * out, axis=1, keepdims=True)
    return out * _inv_sqrt(jnp.maximum(ss, 1e-24), approx)


def _hopfield_row(logits, b_m, matmul_dtype, approx):
    """Hopfield(a, b) given logits = beta * (b @ a.T)  [Nb, Na].

    att = softmax(logits, axis=-1); out = att.T @ b ('TN' contraction, no
    transpose materialized); return row-L2-normalized out  [Na, D].
    """
    m = jnp.max(logits, axis=-1, keepdims=True)
    e = jnp.exp(logits - m)
    att = e * _inv(jnp.sum(e, axis=-1, keepdims=True), approx)          # [Nb, Na]
    out = lax.dot_general(att.astype(matmul_dtype), b_m,
                          (((0,), (0,)), ((), ())),                     # att.T @ b
                          preferred_element_type=jnp.float32)           # [Na, D]
    return _l2_normalize_rows(out, approx)


def _hopfield_col(logits_t, b_m, matmul_dtype, approx):
    """Hopfield(a, b) given the *transposed* logits  logits_t = beta * (a @ b.T)  [Na, Nb].

    softmax(logits_t.T, axis=-1).T == softmax(logits_t, axis=0), so the shared
    Gram matrix is reused with a column softmax and a plain MXU matmul — no
    N x N transpose is ever materialized.
    """
    m = jnp.max(logits_t, axis=0, keepdims=True)
    e = jnp.exp(logits_t - m)
    att_t = e * _inv(jnp.sum(e, axis=0, keepdims=True), approx)         # [Na, Nb] == att.T
    out = lax.dot_general(att_t.astype(matmul_dtype), b_m,
                          (((1,), (0,)), ((), ())),                     # att.T @ b
                          preferred_element_type=jnp.float32)           # [Na, D]
    return _l2_normalize_rows(out, approx)


def _loo_sum_log_ratio(u, v, matmul_dtype, approx):
    """sum_i log(clamp(mat[i,i] / sum_{j!=i} mat[j,i])),  mat = exp(u @ v.T / tau).

    Eye mask / mask matmul / mat.T of the reference are replaced by:
      num   = exp(rowwise_dot(u, v) / tau)                  (VPU)
      denom = colsum(mat) - num, where colsum(mat) is taken as row sums of
              exp(v @ u.T / tau) so no transpose is needed.  (lane reduction)
    """
    um = u.astype(matmul_dtype)
    vm = v.astype(matmul_dtype)
    mat_t = jnp.exp(_gram(vm, um) * INV_TAU)                            # [N, N], mat_t[i,j] = mat[j,i]
    num = jnp.exp(jnp.sum(u * v, axis=1, keepdims=True) * INV_TAU)      # [N, 1]  == diag(mat)
    denom = jnp.sum(mat_t, axis=1, keepdims=True) - num                 # [N, 1]  colsum - diag
    # torch.clamp(..., min=1e-300): underflows to 0 in f32 => no-op, kept for parity.
    ratio = jnp.maximum(num * _inv(denom, approx), 1e-300)
    return jnp.sum(jnp.log(ratio))


# ------------------------------- Pallas kernel --------------------------------

def _make_cloob_kernel(n, matmul_dtype, approx):
    inv_n = 1.0 / float(n)

    def kernel(x_ref, y_ref, loss_ref):
        # Inputs only ever feed the MXU, so they arrive pre-cast to matmul_dtype.
        xm = x_ref[...]                       # [N, D] molecule_embedding
        ym = y_ref[...]                       # [N, D] properties_embedding

        # Shared Gram matrices: 3 instead of 4 N^2*D logit matmuls, no transposes.
        g_xx = BETA * _gram(xm, xm)           # beta * x @ x.T
        g_yy = BETA * _gram(ym, ym)           # beta * y @ y.T
        g_xy = BETA * _gram(xm, ym)           # beta * x @ y.T — shared by Uy and Vx

        ux = _hopfield_row(g_xx, xm, matmul_dtype, approx)   # Hopfield(x, x)
        uy = _hopfield_row(g_xy, xm, matmul_dtype, approx)   # Hopfield(y, x): logits = beta*x@y.T
        vy = _hopfield_row(g_yy, ym, matmul_dtype, approx)   # Hopfield(y, y)
        vx = _hopfield_col(g_xy, ym, matmul_dtype, approx)   # Hopfield(x, y): reuses g_xy (col softmax)

        s_a = _loo_sum_log_ratio(ux, uy, matmul_dtype, approx)
        s_b = _loo_sum_log_ratio(vx, vy, matmul_dtype, approx)

        loss = -(s_a + s_b) * inv_n
        loss_ref[...] = jnp.broadcast_to(loss, (1, 1)).astype(loss_ref.dtype)

    return kernel


def cloob_loss_pallas_batched(xs, ys, *, matmul_dtype=jnp.bfloat16, approx=True):
    """Batch of independent CLOOB losses.  xs, ys: [B, N, D] -> [B] float32."""
    assert xs.shape == ys.shape and xs.ndim == 3
    b, n, d = xs.shape
    # MXU operands: cast once at the boundary (halves HBM->VMEM traffic for bf16).
    xs = xs.astype(matmul_dtype)
    ys = ys.astype(matmul_dtype)

    itemsize = jnp.dtype(matmul_dtype).itemsize
    cost = pl.CostEstimate(
        flops=int(b * 18 * n * n * d),                  # 9 (N,N,D)-matmuls/pair * 2*N^2*D
        transcendentals=int(b * (6 * n * n + 12 * n)),  # softmax/loo exps + rcp/rsqrt
        bytes_accessed=int(2 * b * n * d * itemsize + b * 4),
    )

    kernel = _make_cloob_kernel(n, matmul_dtype, approx)
    out = pl.pallas_call(
        kernel,
        grid=(b,),                                       # one CLOOB instance per grid step
        in_specs=[pl.BlockSpec((None, n, d), lambda i: (i, 0, 0)),   # blocks resident in VMEM
                  pl.BlockSpec((None, n, d), lambda i: (i, 0, 0))],
        out_specs=pl.BlockSpec((None, 1, 1), lambda i: (i, 0, 0)),
        out_shape=jax.ShapeDtypeStruct((b, 1, 1), jnp.float32),
        compiler_params=pltpu.CompilerParams(
            dimension_semantics=("parallel",)),          # shard the batch across v7x's 2 TCs
        cost_estimate=cost,
    )(xs, ys)
    return out[:, 0, 0]


def cloob_loss_pallas(x, y, *, matmul_dtype=jnp.bfloat16, approx=True):
    """Single (molecule_embedding, properties_embedding) pair -> scalar CLOOB loss."""
    return cloob_loss_pallas_batched(x[None], y[None],
                                     matmul_dtype=matmul_dtype, approx=approx)[0]


# ----------------------------- pure-JAX reference -----------------------------

def cloob_loss_ref(x, y):
    def hopfield(a, b):
        att = jax.nn.softmax(BETA * (b @ a.T), axis=-1)
        out = (b.T @ att).T
        norm = jnp.linalg.norm(out, axis=1, keepdims=True)
        return out / jnp.maximum(norm, 1e-12)

    def loo(u, v):
        n = u.shape[0]
        mat = jnp.exp((u @ v.T) / TAU)
        num = jnp.diagonal(mat)
        mask = jnp.ones((n, n)) - jnp.eye(n)
        denom = jnp.diagonal(mask @ mat)
        return num / denom

    Ux = hopfield(x, x)
    Uy = hopfield(y, x)
    Vx = hopfield(x, y)
    Vy = hopfield(y, y)
    A = jnp.clip(loo(Ux, Uy), 1e-300)
    B = jnp.clip(loo(Vx, Vy), 1e-300)
    return -jnp.mean(jnp.log(A) + jnp.log(B), axis=0)


# ----------------------------------- main --------------------------------------

if __name__ == "__main__":
    B, N, D = 4, 8, 32   # batch of independent (molecule, properties) embedding pairs
    key = jax.random.PRNGKey(0)
    kx, ky = jax.random.split(key)
    xs = jax.random.normal(kx, (B, N, D), dtype=jnp.float32)
    ys = jax.random.normal(ky, (B, N, D), dtype=jnp.float32)
    # CLIP-style embeddings are L2-normalized (glue, outside the kernel).
    xs = xs / jnp.linalg.norm(xs, axis=-1, keepdims=True)
    ys = ys / jnp.linalg.norm(ys, axis=-1, keepdims=True)

    # 1) Parity path: f32 MXU operands + exact reciprocal/sqrt, single pair.
    loss = cloob_loss_pallas(xs[0], ys[0], matmul_dtype=jnp.float32, approx=False)
    jax.block_until_ready(loss)
    ref0 = cloob_loss_ref(xs[0], ys[0])
    assert jnp.allclose(loss, ref0, rtol=5e-3, atol=1e-3), (loss, ref0)

    # 2) Performance path: bf16 MXU operands (f32 accumulation), EUP approx
    #    reciprocal/rsqrt, batched grid with "parallel" semantics.
    losses = cloob_loss_pallas_batched(xs, ys)           # defaults: bf16 + approx
    jax.block_until_ready(losses)
    refs = jnp.stack([cloob_loss_ref(xs[i], ys[i]) for i in range(B)])
    assert jnp.allclose(losses, refs, rtol=1e-1, atol=2e-2), (losses, refs)

    print("KERNEL_OK")
</pallas_src>

<mosaic_0001>
module attributes {stable_mosaic.version = 11 : i64} {
  func.func @kernel(%arg0: i32, %arg1: memref<1x8x32xf32, #tpu.memory_space<vmem>>, %arg2: memref<1x8x32xf32, #tpu.memory_space<vmem>>, %arg3: memref<1x1x1xf32, #tpu.memory_space<vmem>>) attributes {dimension_semantics = [#tpu.dimension_semantics<parallel>], iteration_bounds = array<i64: 1>, scalar_prefetch = 0 : i64, scratch_operands = 0 : i64, tpu.core_type = #tpu.core_type<tc>, window_params = [{transform_indices = @transform_0, window_bounds = array<i64: 1, 8, 32>}, {transform_indices = @transform_1, window_bounds = array<i64: 1, 8, 32>}, {transform_indices = @transform_2, window_bounds = array<i64: 1, 1, 1>}]} {
    %c0 = arith.constant 0 : index
    %c0_0 = arith.constant 0 : index
    %c0_1 = arith.constant 0 : index
    %0 = vector.load %arg1[%c0, %c0_0, %c0_1] : memref<1x8x32xf32, #tpu.memory_space<vmem>>, vector<1x8x32xf32>
    %1 = vector.shape_cast %0 : vector<1x8x32xf32> to vector<8x32xf32>
    %c0_2 = arith.constant 0 : index
    %c0_3 = arith.constant 0 : index
    %c0_4 = arith.constant 0 : index
    %2 = vector.load %arg2[%c0_2, %c0_3, %c0_4] : memref<1x8x32xf32, #tpu.memory_space<vmem>>, vector<1x8x32xf32>
    %3 = vector.shape_cast %2 : vector<1x8x32xf32> to vector<8x32xf32>
    %cst = arith.constant dense<0.000000e+00> : vector<8x8xf32>
    %4 = tpu.matmul %1, %1, %cst {dimension_numbers = #tpu.dot_dimension_numbers<[1], [1], [0], [0], [0, 0, 1, 0], [], []>} : vector<8x32xf32>, vector<8x32xf32>, vector<8x8xf32> -> vector<8x8xf32>
    %cst_5 = arith.constant 8.000000e+00 : f32
    %5 = vector.broadcast %cst_5 : f32 to vector<8x8xf32>
    %6 = arith.mulf %5, %4 : vector<8x8xf32>
    %cst_6 = arith.constant dense<0.000000e+00> : vector<8x8xf32>
    %7 = tpu.matmul %3, %3, %cst_6 {dimension_numbers = #tpu.dot_dimension_numbers<[1], [1], [0], [0], [0, 0, 1, 0], [], []>} : vector<8x32xf32>, vector<8x32xf32>, vector<8x8xf32> -> vector<8x8xf32>
    %cst_7 = arith.constant 8.000000e+00 : f32
    %8 = vector.broadcast %cst_7 : f32 to vector<8x8xf32>
    %9 = arith.mulf %8, %7 : vector<8x8xf32>
    %cst_8 = arith.constant dense<0.000000e+00> : vector<8x8xf32>
    %10 = tpu.matmul %1, %3, %cst_8 {dimension_numbers = #tpu.dot_dimension_numbers<[1], [1], [0], [0], [0, 0, 1, 0], [], []>} : vector<8x32xf32>, vector<8x32xf32>, vector<8x8xf32> -> vector<8x8xf32>
    %cst_9 = arith.constant 8.000000e+00 : f32
    %11 = vector.broadcast %cst_9 : f32 to vector<8x8xf32>
    %12 = arith.mulf %11, %10 : vector<8x8xf32>
    %cst_10 = arith.constant dense<0xFF800000> : vector<8xf32>
    %13 = vector.multi_reduction <maximumf>, %6, %cst_10 [1] : vector<8x8xf32> to vector<8xf32>
    %14 = vector.shape_cast %13 : vector<8xf32> to vector<8x1xf32>
    %15 = vector.broadcast %14 : vector<8x1xf32> to vector<8x8xf32>
    %16 = arith.subf %6, %15 : vector<8x8xf32>
    %17 = math.exp %16 : vector<8x8xf32>
    %cst_11 = arith.constant dense<0.000000e+00> : vector<8xf32>
    %18 = vector.multi_reduction <add>, %17, %cst_11 [1] : vector<8x8xf32> to vector<8xf32>
    %19 = vector.shape_cast %18 : vector<8xf32> to vector<8x1xf32>
    %cst_12 = arith.constant 1.000000e+00 : f32
    %20 = vector.broadcast %cst_12 : f32 to vector<8x1xf32>
    %21 = arith.divf %20, %19 : vector<8x1xf32>
    %22 = vector.broadcast %21 : vector<8x1xf32> to vector<8x8xf32>
    %23 = arith.mulf %17, %22 : vector<8x8xf32>
    %cst_13 = arith.constant dense<0.000000e+00> : vector<8x32xf32>
    %24 = tpu.matmul %23, %1, %cst_13 {dimension_numbers = #tpu.dot_dimension_numbers<[0], [0], [1], [1], [0, 1, 1, 1], [], []>} : vector<8x8xf32>, vector<8x32xf32>, vector<8x32xf32> -> vector<8x32xf32>
    %25 = arith.mulf %24, %24 : vector<8x32xf32>
    %cst_14 = arith.constant dense<0.000000e+00> : vector<8xf32>
    %26 = vector.multi_reduction <add>, %25, %cst_14 [1] : vector<8x32xf32> to vector<8xf32>
    %27 = vector.shape_cast %26 : vector<8xf32> to vector<8x1xf32>
    %cst_15 = arith.constant 1.000000e-24 : f32
    %28 = vector.broadcast %cst_15 : f32 to vector<8x1xf32>
    %29 = arith.maximumf %27, %28 : vector<8x1xf32>
    %30 = math.sqrt %29 : vector<8x1xf32>
    %cst_16 = arith.constant 1.000000e+00 : f32
    %31 = vector.broadcast %cst_16 : f32 to vector<8x1xf32>
    %32 = arith.divf %31, %30 : vector<8x1xf32>
    %33 = vector.broadcast %32 : vector<8x1xf32> to vector<8x32xf32>
    %34 = arith.mulf %24, %33 : vector<8x32xf32>
    %cst_17 = arith.constant dense<0xFF800000> : vector<8xf32>
    %35 = vector.multi_reduction <maximumf>, %12, %cst_17 [1] : vector<8x8xf32> to vector<8xf32>
    %36 = vector.shape_cast %35 : vector<8xf32> to vector<8x1xf32>
    %37 = vector.broadcast %36 : vector<8x1xf32> to vector<8x8xf32>
    %38 = arith.subf %12, %37 : vector<8x8xf32>
    %39 = math.exp %38 : vector<8x8xf32>
    %cst_18 = arith.constant dense<0.000000e+00> : vector<8xf32>
    %40 = vector.multi_reduction <add>, %39, %cst_18 [1] : vector<8x8xf32> to vector<8xf32>
    %41 = vector.shape_cast %40 : vector<8xf32> to vector<8x1xf32>
    %cst_19 = arith.constant 1.000000e+00 : f32
    %42 = vector.broadcast %cst_19 : f32 to vector<8x1xf32>
    %43 = arith.divf %42, %41 : vector<8x1xf32>
    %44 = vector.broadcast %43 : vector<8x1xf32> to vector<8x8xf32>
    %45 = arith.mulf %39, %44 : vector<8x8xf32>
    %cst_20 = arith.constant dense<0.000000e+00> : vector<8x32xf32>
    %46 = tpu.matmul %45, %1, %cst_20 {dimension_numbers = #tpu.dot_dimension_numbers<[0], [0], [1], [1], [0, 1, 1, 1], [], []>} : vector<8x8xf32>, vector<8x32xf32>, vector<8x32xf32> -> vector<8x32xf32>
    %47 = arith.mulf %46, %46 : vector<8x32xf32>
    %cst_21 = arith.constant dense<0.000000e+00> : vector<8xf32>
    %48 = vector.multi_reduction <add>, %47, %cst_21 [1] : vector<8x32xf32> to vector<8xf32>
    %49 = vector.shape_cast %48 : vector<8xf32> to vector<8x1xf32>
    %cst_22 = arith.constant 1.000000e-24 : f32
    %50 = vector.broadcast %cst_22 : f32 to vector<8x1xf32>
    %51 = arith.maximumf %49, %50 : vector<8x1xf32>
    %52 = math.sqrt %51 : vector<8x1xf32>
    %cst_23 = arith.constant 1.000000e+00 : f32
    %53 = vector.broadcast %cst_23 : f32 to vector<8x1xf32>
    %54 = arith.divf %53, %52 : vector<8x1xf32>
    %55 = vector.broadcast %54 : vector<8x1xf32> to vector<8x32xf32>
    %56 = arith.mulf %46, %55 : vector<8x32xf32>
    %cst_24 = arith.constant dense<0xFF800000> : vector<8xf32>
    %57 = vector.multi_reduction <maximumf>, %9, %cst_24 [1] : vector<8x8xf32> to vector<8xf32>
    %58 = vector.shape_cast %57 : vector<8xf32> to vector<8x1xf32>
    %59 = vector.broadcast %58 : vector<8x1xf32> to vector<8x8xf32>
    %60 = arith.subf %9, %59 : vector<8x8xf32>
    %61 = math.exp %60 : vector<8x8xf32>
    %cst_25 = arith.constant dense<0.000000e+00> : vector<8xf32>
    %62 = vector.multi_reduction <add>, %61, %cst_25 [1] : vector<8x8xf32> to vector<8xf32>
    %63 = vector.shape_cast %62 : vector<8xf32> to vector<8x1xf32>
    %cst_26 = arith.constant 1.000000e+00 : f32
    %64 = vector.broadcast %cst_26 : f32 to vector<8x1xf32>
    %65 = arith.divf %64, %63 : vector<8x1xf32>
    %66 = vector.broadcast %65 : vector<8x1xf32> to vector<8x8xf32>
    %67 = arith.mulf %61, %66 : vector<8x8xf32>
    %cst_27 = arith.constant dense<0.000000e+00> : vector<8x32xf32>
    %68 = tpu.matmul %67, %3, %cst_27 {dimension_numbers = #tpu.dot_dimension_numbers<[0], [0], [1], [1], [0, 1, 1, 1], [], []>} : vector<8x8xf32>, vector<8x32xf32>, vector<8x32xf32> -> vector<8x32xf32>
    %69 = arith.mulf %68, %68 : vector<8x32xf32>
    %cst_28 = arith.constant dense<0.000000e+00> : vector<8xf32>
    %70 = vector.multi_reduction <add>, %69, %cst_28 [1] : vector<8x32xf32> to vector<8xf32>
    %71 = vector.shape_cast %70 : vector<8xf32> to vector<8x1xf32>
    %cst_29 = arith.constant 1.000000e-24 : f32
    %72 = vector.broadcast %cst_29 : f32 to vector<8x1xf32>
    %73 = arith.maximumf %71, %72 : vector<8x1xf32>
    %74 = math.sqrt %73 : vector<8x1xf32>
    %cst_30 = arith.constant 1.000000e+00 : f32
    %75 = vector.broadcast %cst_30 : f32 to vector<8x1xf32>
    %76 = arith.divf %75, %74 : vector<8x1xf32>
    %77 = vector.broadcast %76 : vector<8x1xf32> to vector<8x32xf32>
    %78 = arith.mulf %68, %77 : vector<8x32xf32>
    %cst_31 = arith.constant dense<0xFF800000> : vector<8xf32>
    %79 = vector.multi_reduction <maximumf>, %12, %cst_31 [0] : vector<8x8xf32> to vector<8xf32>
    %80 = vector.shape_cast %79 : vector<8xf32> to vector<1x8xf32>
    %81 = vector.broadcast %80 : vector<1x8xf32> to vector<8x8xf32>
    %82 = arith.subf %12, %81 : vector<8x8xf32>
    %83 = math.exp %82 : vector<8x8xf32>
    %cst_32 = arith.constant dense<0.000000e+00> : vector<8xf32>
    %84 = vector.multi_reduction <add>, %83, %cst_32 [0] : vector<8x8xf32> to vector<8xf32>
    %85 = vector.shape_cast %84 : vector<8xf32> to vector<1x8xf32>
    %cst_33 = arith.constant 1.000000e+00 : f32
    %86 = vector.broadcast %cst_33 : f32 to vector<1x8xf32>
    %87 = arith.divf %86, %85 : vector<1x8xf32>
    %88 = vector.broadcast %87 : vector<1x8xf32> to vector<8x8xf32>
    %89 = arith.mulf %83, %88 : vector<8x8xf32>
    %cst_34 = arith.constant dense<0.000000e+00> : vector<8x32xf32>
    %90 = tpu.matmul %89, %3, %cst_34 {dimension_numbers = #tpu.dot_dimension_numbers<[1], [0], [0], [1], [0, 0, 1, 1], [], []>} : vector<8x8xf32>, vector<8x32xf32>, vector<8x32xf32> -> vector<8x32xf32>
    %91 = arith.mulf %90, %90 : vector<8x32xf32>
    %cst_35 = arith.constant dense<0.000000e+00> : vector<8xf32>
    %92 = vector.multi_reduction <add>, %91, %cst_35 [1] : vector<8x32xf32> to vector<8xf32>
    %93 = vector.shape_cast %92 : vector<8xf32> to vector<8x1xf32>
    %cst_36 = arith.constant 1.000000e-24 : f32
    %94 = vector.broadcast %cst_36 : f32 to vector<8x1xf32>
    %95 = arith.maximumf %93, %94 : vector<8x1xf32>
    %96 = math.sqrt %95 : vector<8x1xf32>
    %cst_37 = arith.constant 1.000000e+00 : f32
    %97 = vector.broadcast %cst_37 : f32 to vector<8x1xf32>
    %98 = arith.divf %97, %96 : vector<8x1xf32>
    %99 = vector.broadcast %98 : vector<8x1xf32> to vector<8x32xf32>
    %100 = arith.mulf %90, %99 : vector<8x32xf32>
    %cst_38 = arith.constant dense<0.000000e+00> : vector<8x8xf32>
    %101 = tpu.matmul %56, %34, %cst_38 {dimension_numbers = #tpu.dot_dimension_numbers<[1], [1], [0], [0], [0, 0, 1, 0], [], []>} : vector<8x32xf32>, vector<8x32xf32>, vector<8x8xf32> -> vector<8x8xf32>
    %cst_39 = arith.constant 1.000000e+01 : f32
    %102 = vector.broadcast %cst_39 : f32 to vector<8x8xf32>
    %103 = arith.mulf %101, %102 : vector<8x8xf32>
    %104 = math.exp %103 : vector<8x8xf32>
    %105 = arith.mulf %34, %56 : vector<8x32xf32>
    %cst_40 = arith.constant dense<0.000000e+00> : vector<8xf32>
    %106 = vector.multi_reduction <add>, %105, %cst_40 [1] : vector<8x32xf32> to vector<8xf32>
    %107 = vector.shape_cast %106 : vector<8xf32> to vector<8x1xf32>
    %cst_41 = arith.constant 1.000000e+01 : f32
    %108 = vector.broadcast %cst_41 : f32 to vector<8x1xf32>
    %109 = arith.mulf %107, %108 : vector<8x1xf32>
    %110 = math.exp %109 : vector<8x1xf32>
    %cst_42 = arith.constant dense<0.000000e+00> : vector<8xf32>
    %111 = vector.multi_reduction <add>, %104, %cst_42 [1] : vector<8x8xf32> to vector<8xf32>
    %112 = vector.shape_cast %111 : vector<8xf32> to vector<8x1xf32>
    %113 = arith.subf %112, %110 : vector<8x1xf32>
    %cst_43 = arith.constant 1.000000e+00 : f32
    %114 = vector.broadcast %cst_43 : f32 to vector<8x1xf32>
    %115 = arith.divf %114, %113 : vector<8x1xf32>
    %116 = arith.mulf %110, %115 : vector<8x1xf32>
    %cst_44 = arith.constant 0.000000e+00 : f32
    %117 = vector.broadcast %cst_44 : f32 to vector<8x1xf32>
    %118 = arith.maximumf %116, %117 : vector<8x1xf32>
    %119 = math.log %118 : vector<8x1xf32>
    %120 = vector.shape_cast %119 : vector<8x1xf32> to vector<1x8x1xf32>
    %cst_45 = arith.constant dense<0.000000e+00> : vector<1xf32>
    %121 = vector.multi_reduction <add>, %120, %cst_45 [1, 2] : vector<1x8x1xf32> to vector<1xf32>
    %122 = vector.shape_cast %121 : vector<1xf32> to vector<1x1x1xf32>
    %123 = vector.extract %122[0, 0, 0] : f32 from vector<1x1x1xf32>
    %cst_46 = arith.constant dense<0.000000e+00> : vector<8x8xf32>
    %124 = tpu.matmul %78, %100, %cst_46 {dimension_numbers = #tpu.dot_dimension_numbers<[1], [1], [0], [0], [0, 0, 1, 0], [], []>} : vector<8x32xf32>, vector<8x32xf32>, vector<8x8xf32> -> vector<8x8xf32>
    %cst_47 = arith.constant 1.000000e+01 : f32
    %125 = vector.broadcast %cst_47 : f32 to vector<8x8xf32>
    %126 = arith.mulf %124, %125 : vector<8x8xf32>
    %127 = math.exp %126 : vector<8x8xf32>
    %128 = arith.mulf %100, %78 : vector<8x32xf32>
    %cst_48 = arith.constant dense<0.000000e+00> : vector<8xf32>
    %129 = vector.multi_reduction <add>, %128, %cst_48 [1] : vector<8x32xf32> to vector<8xf32>
    %130 = vector.shape_cast %129 : vector<8xf32> to vector<8x1xf32>
    %cst_49 = arith.constant 1.000000e+01 : f32
    %131 = vector.broadcast %cst_49 : f32 to vector<8x1xf32>
    %132 = arith.mulf %130, %131 : vector<8x1xf32>
    %133 = math.exp %132 : vector<8x1xf32>
    %cst_50 = arith.constant dense<0.000000e+00> : vector<8xf32>
    %134 = vector.multi_reduction <add>, %127, %cst_50 [1] : vector<8x8xf32> to vector<8xf32>
    %135 = vector.shape_cast %134 : vector<8xf32> to vector<8x1xf32>
    %136 = arith.subf %135, %133 : vector<8x1xf32>
    %cst_51 = arith.constant 1.000000e+00 : f32
    %137 = vector.broadcast %cst_51 : f32 to vector<8x1xf32>
    %138 = arith.divf %137, %136 : vector<8x1xf32>
    %139 = arith.mulf %133, %138 : vector<8x1xf32>
    %cst_52 = arith.constant 0.000000e+00 : f32
    %140 = vector.broadcast %cst_52 : f32 to vector<8x1xf32>
    %141 = arith.maximumf %139, %140 : vector<8x1xf32>
    %142 = math.log %141 : vector<8x1xf32>
    %143 = vector.shape_cast %142 : vector<8x1xf32> to vector<1x8x1xf32>
    %cst_53 = arith.constant dense<0.000000e+00> : vector<1xf32>
    %144 = vector.multi_reduction <add>, %143, %cst_53 [1, 2] : vector<1x8x1xf32> to vector<1xf32>
    %145 = vector.shape_cast %144 : vector<1xf32> to vector<1x1x1xf32>
    %146 = vector.extract %145[0, 0, 0] : f32 from vector<1x1x1xf32>
    %147 = arith.addf %123, %146 : f32
    %cst_54 = arith.constant 0.000000e+00 : f32
    %148 = arith.subf %cst_54, %147 : f32
    %cst_55 = arith.constant 1.250000e-01 : f32
    %149 = arith.mulf %148, %cst_55 : f32
    %150 = vector.broadcast %149 : f32 to vector<1x1xf32>
    %c0_56 = arith.constant 0 : index
    %c0_57 = arith.constant 0 : index
    %c0_58 = arith.constant 0 : index
    %151 = vector.load %arg3[%c0_56, %c0_57, %c0_58] : memref<1x1x1xf32, #tpu.memory_space<vmem>>, vector<1x1x1xf32>
    %152 = vector.shape_cast %151 : vector<1x1x1xf32> to vector<1x1xf32>
    %153 = vector.shape_cast %150 : vector<1x1xf32> to vector<1x1x1xf32>
    tpu.vector_store %arg3[%c0_56, %c0_57, %c0_58], %153 {strides = array<i32>} : memref<1x1x1xf32, #tpu.memory_space<vmem>>, vector<1x1x1xf32>,
    return
  }
  func.func @transform_0(%arg0: i32) -> (i32, i32, i32) {
    %c0_i32 = arith.constant 0 : i32
    %c0_i32_0 = arith.constant 0 : i32
    %c0_i32_1 = arith.constant 0 : i32
    return %arg0, %c0_i32, %c0_i32_0 : i32, i32, i32
  }
  func.func @transform_1(%arg0: i32) -> (i32, i32, i32) {
    %c0_i32 = arith.constant 0 : i32
    %c0_i32_0 = arith.constant 0 : i32
    %c0_i32_1 = arith.constant 0 : i32
    return %arg0, %c0_i32, %c0_i32_0 : i32, i32, i32
  }
  func.func @transform_2(%arg0: i32) -> (i32, i32, i32) {
    %c0_i32 = arith.constant 0 : i32
    %c0_i32_0 = arith.constant 0 : i32
    %c0_i32_1 = arith.constant 0 : i32
    return %arg0, %c0_i32, %c0_i32_0 : i32, i32, i32
  }
}

</mosaic_0001>

<bundles_post_ra>
// kernel: tpu_custom_call.1
= control target key start
LH: loop header
LB: loop body
LE: loop exit
PB: predicated region body
PF: predicated region fallthrough
CT: control target
= control target key end

     0   :  { %7 = vsyncpa [#allocation3], 0  ;;  %s926_s0 = inlined_call_operand.hbm [shape: f32[1,8,32], index: 0, kind: input, shape index: {}]   ;;  %s927_s1 = inlined_call_operand.hbm [shape: f32[1,8,32], index: 1, kind: input, shape index: {}]   ;;  %s928_s2 = inlined_call_operand.hbm [shape: f32[1,1,1], index: 2, kind: output, shape index: {}]  }
   0x1   :  { %8 = vsyncpa [#allocation6], 0 }
   0x2   :  { %9 = vsyncpa [#allocation4], 0  ;;  %s15_s11 = sshll.u32 %s926_s0, 4  ;;  %s851_s12 = smov [#allocation2]   ;;  %s16_s11 = int_to_ptr.hbm [resolvable:$true] %s15_s11 }
   0x3   :  { %s17_s13 = sshll.u32 %s851_s12, 4  ;;  %s26_s16 = sshll.u32 %s927_s1, 4  ;;  %s18_s13 = int_to_ptr.vmem [resolvable:$true] %s17_s13  ;;  %s27_s16 = int_to_ptr.hbm [resolvable:$true] %s26_s16 }
   0x4   :  { %20 = dma.hbm_to_vmem [thread:$0]  %s16_s11, 128, %s18_s13, [#allocation3]  }
   0x5   :  { %s852_s17 = smov [#allocation5]  }
   0x6   :  { %s28_s18 = sshll.u32 %s852_s17, 4  ;;  %s29_s18 = int_to_ptr.vmem [resolvable:$true] %s28_s18 }
   0x7   :  { %31 = dma.hbm_to_vmem [thread:$0]  %s27_s16, 128, %s29_s18, [#allocation6]  }
   0x8   :  { %845 = dma.done.wait [#allocation3], 128  }
   0x9   :  { %846 = vsyncadd [#allocation3], 4294967168 }
   0xa   :  { %847 = dma.done.wait [#allocation6], 128  }
   0xb   :  { %848 = vsyncadd [#allocation6], 4294967168  ;;  %vm42_vm0 = vcmask 261120   ;;  %v40_v0 = vld [vmem:[#allocation2] sm:$0xff]  ;;  %v41_v1 = vld [vmem:[#allocation5] sm:$0xff]  ;;  %vm112_vm1 = vcmask 64512  }
   0xc   :  { %703 = vmatpush.xpose.msk.msra.mxu0 %vm42_vm0, %v40_v0  ;;  %705 = vmatpush.xpose.msk.msra.mxu1 %vm42_vm0, %v41_v1  ;;  %s853_s20 = smov [#allocation7]   ;;  %s692_s25 = sshll.u32 %s928_s2, 4  ;;  %s693_s25 = int_to_ptr.hbm [resolvable:$true] %s692_s25 }
   0xd   :  { %707 = vmatpush.xpose.msk.msra.mxu2 %vm42_vm0, %v41_v1  ;;  %188 = vmatpush.msra.mxu3 %v40_v0  ;;  %s690_s21 = sshll.u32 %s853_s20, 4  ;;  %s691_s21 = int_to_ptr.vmem [resolvable:$true] %s690_s21 }
   0xf   :  { %704 = vmatmul.msk.f32.vlgmr.msra.gmra.mxu0 %vm42_vm0, %v40_v0  ;;  %706 = vmatmul.msk.f32.vlgmr.msra.gmra.mxu1 %vm42_vm0, %v41_v1 }
  0x10   :  { %502 = vmatpush.msrb.mxu1 %v41_v1  ;;  %414 = vmatpush.msrb.mxu0 %v41_v1 }
  0x11   :  { %708 = vmatmul.msk.f32.vlgmr.msra.gmra.mxu2 %vm42_vm0, %v40_v0  ;;  %301 = vmatpush.msrb.mxu3 %v40_v0 }
  0x8c   :  { %v63_v2 = vpop.f32.mrf.mxu0  ;;  %v87_v3 = vpop.f32.mrf.mxu1 }
  0x8d   :  { %v66_v4 = vmul.f32 8.0, %v63_v2  ;;  %v90_v5 = vmul.f32 8.0, %v87_v3 }
  0x8f   :  { %v339_v6 = vsel %vm112_vm1, %v90_v5, -inf  ;;  %v113_v7 = vsel %vm112_vm1, %v66_v4, -inf }
  0x90   :  { %340 = vmax.xlane.f32.xlu1 %v339_v6  ;;  %114 = vmax.xlane.f32.xlu0 %v113_v7 }
  0x94   :  { %v108_v8 = vpop.f32.mrf.mxu2 }
  0x95   :  { %v111_v9 = vmul.f32 8.0, %v108_v8 }
  0x97   :  { %v226_v10 = vsel %vm112_vm1, %v111_v9, -inf }
  0x98   :  { %v452_v11 = vrot.slane %v226_v10, 4  ;;  %227 = vmax.xlane.f32.xlu0 %v226_v10 }
  0x9a   :  { %v453_v12 = vmax.f32 %v226_v10, %v452_v11 }
  0x9c   :  { %v454_v13 = vrot.slane %v453_v12, 2 }
  0x9e   :  { %v455_v14 = vmax.f32 %v453_v12, %v454_v13 }
  0xa0   :  { %v456_v15 = vrot.slane %v455_v14, 1 }
  0xa2   :  { %v457_v16 = vmax.f32 %v455_v14, %v456_v15 }
  0xa4   :  { %v458_v17 = vsub.f32 %v111_v9, %v457_v16 }
  0xa6   :  { %v459_v18 = vmul.f32 1.442695, %v458_v17 }
  0xa8   :  { %725 = vpow2.f32 %v459_v18 }
  0xae   :  { %v726_v19 = vpop.eup %725 }
  0xaf   :  { %v461_v20 = vsel %vm112_vm1, %v726_v19, 0.0 }
  0xb0   :  { %v462_v21 = vrot.slane %v461_v20, 4 }
  0xb2   :  { %v463_v22 = vadd.f32 %v462_v21, %v461_v20 }
  0xb4   :  { %v464_v23 = vrot.slane %v463_v22, 2 }
  0xb6   :  { %v465_v24 = vadd.f32 %v464_v23, %v463_v22 }
  0xb8   :  { %v466_v25 = vrot.slane %v465_v24, 1 }
  0xba   :  { %v467_v26 = vadd.f32 %v466_v25, %v465_v24 }
  0xbc   :  { %727 = vrcp.f32 %v467_v26  ;;  %v479_v30 = vand.u32 2147483648, %v467_v26  ;;  %v477_v32 = vand.u32 2147483647, %v467_v26  ;;  %vm473_vm3 = vweird.f32 %v467_v26 }
  0xbe   :  { %v480_v34 = vor.u32 1.1754944e-38, %v479_v30  ;;  %vm478_vm5 = vcmp.eq.f32.partialorder %v477_v32, 8.507059e+37 }
  0xc2   :  { %v728_v27 = vpop.eup %727 }
  0xc3   :  { %v469_v28 = vmul.f32 %v728_v27, %v467_v26  ;;  %vm474_vm2 = vweird.f32 %v728_v27 }
  0xc4   :  { %vm475_vm4 = vmor %vm473_vm3, %vm474_vm2 }
  0xc5   :  { %v470_v29 = vsub.f32 1.0, %v469_v28 }
  0xc7   :  { %v471_v31 = vmul.f32 %v728_v27, %v470_v29 }
  0xc9   :  { %v472_v33 = vadd.f32 %v728_v27, %v471_v31 }
  0xcb   :  { %v476_v35 = vsel %vm475_vm4, %v728_v27, %v472_v33 }
  0xcc   :  { %v481_v36 = vsel %vm478_vm5, %v480_v34, %v476_v35 }
  0xcd   :  { %v483_v37 = vmul.f32 %v726_v19, %v481_v36 }
  0xcf   :  { %712 = vmatmul.msk.f32.vlgmr.msrb.gmra.mxu1 %vm112_vm1, %v483_v37 }
 0x103   :  { %v115_v38 = vpop.xlane.xlu0 %114  ;;  %v341_v41 = vpop.xlane.xlu1 %340 }
 0x104   :  { %v116_v39 = vsub.f32 %v66_v4, %v115_v38  ;;  %v342_v44 = vsub.f32 %v90_v5, %v341_v41 }
 0x106   :  { %v117_v40 = vmul.f32 1.442695, %v116_v39  ;;  %v343_v48 = vmul.f32 1.442695, %v342_v44 }
 0x108   :  { %729 = vpow2.f32 %v117_v40 }
 0x10b   :  { %v228_v42 = vpop.xlane.xlu0 %227 }
 0x10c   :  { %v229_v43 = vsub.f32 %v111_v9, %v228_v42 }
 0x10e   :  { %v230_v45 = vmul.f32 1.442695, %v229_v43  ;;  %v730_v46 = vpop.eup %729 }
 0x10f   :  { %v119_v47 = vsel %vm112_vm1, %v730_v46, 0.0 }
 0x110   :  { %731 = vpow2.f32 %v230_v45  ;;  %120 = vadd.xlane.f32.xlu1 %v119_v47 }
 0x111   :  { %733 = vpow2.f32 %v343_v48 }
 0x116   :  { %v732_v49 = vpop.eup %731 }
 0x117   :  { %v232_v50 = vsel %vm112_vm1, %v732_v49, 0.0  ;;  %v734_v51 = vpop.eup %733 }
 0x118   :  { %233 = vadd.xlane.f32.xlu2 %v232_v50  ;;  %v345_v52 = vsel %vm112_vm1, %v734_v51, 0.0 }
 0x120   :  { %346 = vadd.xlane.f32.xlu2 %v345_v52 }
 0x14c   :  { %v504_v25 = vpop.f32.mrf.mxu1 }
 0x14d   :  { %v507_v26 = vmul.f32 %v504_v25, %v504_v25 }
 0x14f   :  { %v508_v27 = vsel %vm42_vm0, %v507_v26, 0.0 }
 0x183   :  { %v121_v53 = vpop.xlane.xlu1 %120 }
 0x184   :  { %735 = vrcp.f32 %v121_v53  ;;  %v133_v58 = vand.u32 2147483648, %v121_v53  ;;  %v131_v60 = vand.u32 2147483647, %v121_v53  ;;  %vm127_vm7 = vweird.f32 %v121_v53 }
 0x186   :  { %v134_v1 = vor.u32 1.1754944e-38, %v133_v58  ;;  %vm132_vm9 = vcmp.eq.f32.partialorder %v131_v60, 8.507059e+37 }
 0x18a   :  { %v736_v54 = vpop.eup %735 }
 0x18b   :  { %v234_v55 = vpop.xlane.xlu2 %233  ;;  %v123_v56 = vmul.f32 %v736_v54, %v121_v53  ;;  %vm128_vm6 = vweird.f32 %v736_v54 }
 0x18c   :  { %737 = vrcp.f32 %v234_v55  ;;  %vm129_vm8 = vmor %vm127_vm7, %vm128_vm6  ;;  %v246_v6 = vand.u32 2147483648, %v234_v55  ;;  %v244_v8 = vand.u32 2147483647, %v234_v55  ;;  %vm240_vm11 = vweird.f32 %v234_v55 }
 0x18d   :  { %v124_v57 = vsub.f32 1.0, %v123_v56 }
 0x18e   :  { %v247_v11 = vor.u32 1.1754944e-38, %v246_v6  ;;  %vm245_vm13 = vcmp.eq.f32.partialorder %v244_v8, 8.507059e+37 }
 0x18f   :  { %v125_v59 = vmul.f32 %v736_v54, %v124_v57 }
 0x191   :  { %v126_v62 = vadd.f32 %v736_v54, %v125_v59 }
 0x192   :  { %v738_v61 = vpop.eup %737 }
 0x193   :  { %v236_v63 = vmul.f32 %v738_v61, %v234_v55  ;;  %v347_v0 = vpop.xlane.xlu2 %346  ;;  %v130_v2 = vsel %vm129_vm8, %v736_v54, %v126_v62  ;;  %vm241_vm10 = vweird.f32 %v738_v61 }
 0x194   :  { %739 = vrcp.f32 %v347_v0  ;;  %v135_v4 = vsel %vm132_vm9, %v134_v1, %v130_v2  ;;  %vm242_vm12 = vmor %vm240_vm11, %vm241_vm10  ;;  %v359_v17 = vand.u32 2147483648, %v347_v0  ;;  %v357_v19 = vand.u32 2147483647, %v347_v0 }
 0x195   :  { %v237_v3 = vsub.f32 1.0, %v236_v63  ;;  %v137_v5 = vmul.f32 %v730_v46, %v135_v4  ;;  %vm353_vm15 = vweird.f32 %v347_v0 }
 0x196   :  { %v360_v21 = vor.u32 1.1754944e-38, %v359_v17  ;;  %vm358_vm3 = vcmp.eq.f32.partialorder %v357_v19, 8.507059e+37 }
 0x197   :  { %v238_v7 = vmul.f32 %v738_v61, %v237_v3  ;;  %138 = vxpose.xlu0.b32.start.end [1/1] (short) (narrow) %v137_v5, 8 }
 0x199   :  { %v239_v9 = vadd.f32 %v738_v61, %v238_v7 }
 0x19a   :  { %v740_v10 = vpop.eup %739 }
 0x19b   :  { %v349_v12 = vmul.f32 %v740_v10, %v347_v0  ;;  %v243_v13 = vsel %vm242_vm12, %v738_v61, %v239_v9  ;;  %vm354_vm14 = vweird.f32 %v740_v10 }
 0x19c   :  { %v248_v14 = vsel %vm245_vm13, %v247_v11, %v243_v13  ;;  %vm355_vm2 = vmor %vm353_vm15, %vm354_vm14 }
 0x19d   :  { %v350_v15 = vsub.f32 1.0, %v349_v12  ;;  %v250_v16 = vmul.f32 %v732_v49, %v248_v14 }
 0x19f   :  { %v351_v18 = vmul.f32 %v740_v10, %v350_v15  ;;  %251 = vxpose.xlu1.b32.start.end [1/1] (short) (narrow) %v250_v16, 8 }
 0x1a1   :  { %v352_v20 = vadd.f32 %v740_v10, %v351_v18 }
 0x1a3   :  { %v356_v22 = vsel %vm355_vm2, %v740_v10, %v352_v20 }
 0x1a4   :  { %v361_v23 = vsel %vm358_vm3, %v360_v21, %v356_v22 }
 0x1a5   :  { %v363_v24 = vmul.f32 %v734_v51, %v361_v23 }
 0x1a7   :  { %364 = vxpose.xlu2.b32.start.end [1/1] (short) (narrow) %v363_v24, 8 }
 0x218   :  { %509 = vadd.xlane.f32.xlu2 %v508_v27 }
 0x23b   :  { %v154_v28 = vpop.trf.xlu0 }
 0x23c   :  { %709 = vmatmul.msk.f32.vlgmr.msra.gmra.mxu3 %vm112_vm1, %v154_v28 }
 0x240   :  { %v380_v29 = vpop.trf.xlu2 }
 0x241   :  { %711 = vmatmul.msk.f32.vlgmr.msrb.gmra.mxu0 %vm112_vm1, %v380_v29 }
 0x243   :  { %v267_v30 = vpop.trf.xlu1 }
 0x244   :  { %710 = vmatmul.msk.f32.vlgmr.msrb.gmra.mxu3 %vm112_vm1, %v267_v30 }
 0x28b   :  { %v510_v31 = vpop.xlane.xlu2 %509 }
 0x28c   :  { %v511_v32 = vmax.f32 %v510_v31, 1e-24 }
 0x28e   :  { %741 = vrsqrt.f32 %v511_v32  ;;  %vm519_vm4 = vcmp.eq.f32.partialorder %v511_v32, inf  ;;  %v522_v40 = vand.u32 2147483648, %v511_v32  ;;  %vm521_vm5 = vcmp.eq.f32.partialorder %v511_v32, 0.0 }
 0x294   :  { %v742_v33 = vpop.eup %741 }
 0x295   :  { %v513_v34 = vmul.f32 %v742_v33, %v511_v32 }
 0x297   :  { %v514_v35 = vmul.f32 %v742_v33, %v513_v34 }
 0x299   :  { %v515_v36 = vmul.f32 0.5, %v514_v35 }
 0x29b   :  { %v516_v37 = vsub.f32 1.5, %v515_v36 }
 0x29d   :  { %v517_v38 = vmul.f32 %v742_v33, %v516_v37 }
 0x29f   :  { %v518_v39 = vmul.f32 %v517_v38, %v511_v32 }
 0x2a1   :  { %v520_v41 = vsel %vm519_vm4, %v511_v32, %v518_v39 }
 0x2a2   :  { %v523_v42 = vsel %vm521_vm5, %v522_v40, %v520_v41 }
 0x2a3   :  { %743 = vrcp.f32 %v523_v42  ;;  %v535_v46 = vand.u32 2147483648, %v523_v42  ;;  %v533_v48 = vand.u32 2147483647, %v523_v42  ;;  %vm529_vm7 = vweird.f32 %v523_v42 }
 0x2a5   :  { %v536_v50 = vor.u32 1.1754944e-38, %v535_v46  ;;  %vm534_vm9 = vcmp.eq.f32.partialorder %v533_v48, 8.507059e+37 }
 0x2a9   :  { %v744_v43 = vpop.eup %743 }
 0x2aa   :  { %v525_v44 = vmul.f32 %v744_v43, %v523_v42  ;;  %vm530_vm6 = vweird.f32 %v744_v43 }
 0x2ab   :  { %vm531_vm8 = vmor %vm529_vm7, %vm530_vm6 }
 0x2ac   :  { %v526_v45 = vsub.f32 1.0, %v525_v44 }
 0x2ae   :  { %v527_v47 = vmul.f32 %v744_v43, %v526_v45 }
 0x2b0   :  { %v528_v49 = vadd.f32 %v744_v43, %v527_v47 }
 0x2b2   :  { %v532_v51 = vsel %vm531_vm8, %v744_v43, %v528_v49 }
 0x2b3   :  { %v537_v52 = vsel %vm534_vm9, %v536_v50, %v532_v51 }
 0x2b4   :  { %v893_v53 = vmul.f32 %v537_v52, %v504_v25 }
 0x2b6   :  { %715 = vmatpush.xpose.msk.msra.mxu3 %vm42_vm0, %v893_v53 }
 0x2be   :  { %v901_v56 = vpop.f32.mrf.mxu0 }
 0x2bf   :  { %v897_v54 = vpop.f32.mrf.mxu3  ;;  %v419_v58 = vmul.f32 %v901_v56, %v901_v56 }
 0x2c0   :  { %v193_v55 = vmul.f32 %v897_v54, %v897_v54 }
 0x2c1   :  { %v420_v61 = vsel %vm42_vm0, %v419_v58, 0.0 }
 0x2c2   :  { %v194_v57 = vsel %vm42_vm0, %v193_v55, 0.0 }
 0x2c3   :  { %195 = vadd.xlane.f32.xlu0 %v194_v57 }
 0x2c7   :  { %v906_v59 = vpop.f32.mrf.mxu3 }
 0x2c8   :  { %v306_v60 = vmul.f32 %v906_v59, %v906_v59 }
 0x2ca   :  { %v307_v62 = vsel %vm42_vm0, %v306_v60, 0.0 }
 0x2cb   :  { %308 = vadd.xlane.f32.xlu1 %v307_v62  ;;  %421 = vadd.xlane.f32.xlu0 %v420_v61 }
 0x336   :  { %v196_v63 = vpop.xlane.xlu0 %195 }
 0x337   :  { %v197_v0 = vmax.f32 %v196_v63, 1e-24 }
 0x339   :  { %745 = vrsqrt.f32 %v197_v0  ;;  %vm205_vm10 = vcmp.eq.f32.partialorder %v197_v0, inf  ;;  %v208_v18 = vand.u32 2147483648, %v197_v0  ;;  %vm207_vm11 = vcmp.eq.f32.partialorder %v197_v0, 0.0 }
 0x33e   :  { %v309_v1 = vpop.xlane.xlu1 %308  ;;  %v422_v2 = vpop.xlane.xlu0 %421 }
 0x33f   :  { %v746_v3 = vpop.eup %745  ;;  %v310_v4 = vmax.f32 %v309_v1, 1e-24  ;;  %v423_v5 = vmax.f32 %v422_v2, 1e-24 }
 0x340   :  { %v199_v6 = vmul.f32 %v746_v3, %v197_v0 }
 0x341   :  { %747 = vrsqrt.f32 %v310_v4  ;;  %vm318_vm12 = vcmp.eq.f32.partialorder %v310_v4, inf  ;;  %v321_v29 = vand.u32 2147483648, %v310_v4  ;;  %vm431_vm13 = vcmp.eq.f32.partialorder %v423_v5, inf }
 0x342   :  { %749 = vrsqrt.f32 %v423_v5  ;;  %v200_v7 = vmul.f32 %v746_v3, %v199_v6  ;;  %vm320_vm14 = vcmp.eq.f32.partialorder %v310_v4, 0.0  ;;  %v434_v32 = vand.u32 2147483648, %v423_v5 }
 0x343   :  { %vm433_vm15 = vcmp.eq.f32.partialorder %v423_v5, 0.0 }
 0x344   :  { %v201_v8 = vmul.f32 0.5, %v200_v7 }
 0x346   :  { %v202_v9 = vsub.f32 1.5, %v201_v8 }
 0x347   :  { %v748_v10 = vpop.eup %747 }
 0x348   :  { %v750_v11 = vpop.eup %749  ;;  %v312_v12 = vmul.f32 %v748_v10, %v310_v4  ;;  %v203_v13 = vmul.f32 %v746_v3, %v202_v9 }
 0x349   :  { %v425_v14 = vmul.f32 %v750_v11, %v423_v5 }
 0x34a   :  { %v313_v15 = vmul.f32 %v748_v10, %v312_v12  ;;  %v204_v16 = vmul.f32 %v203_v13, %v197_v0 }
 0x34b   :  { %v426_v17 = vmul.f32 %v750_v11, %v425_v14 }
 0x34c   :  { %v314_v19 = vmul.f32 0.5, %v313_v15  ;;  %v206_v20 = vsel %vm205_vm10, %v197_v0, %v204_v16 }
 0x34d   :  { %v427_v21 = vmul.f32 0.5, %v426_v17  ;;  %v209_v22 = vsel %vm207_vm11, %v208_v18, %v206_v20 }
 0x34e   :  { %v315_v23 = vsub.f32 1.5, %v314_v19  ;;  %751 = vrcp.f32 %v209_v22  ;;  %v221_v38 = vand.u32 2147483648, %v209_v22  ;;  %v219_v40 = vand.u32 2147483647, %v209_v22 }
 0x34f   :  { %v428_v24 = vsub.f32 1.5, %v427_v21  ;;  %vm215_vm3 = vweird.f32 %v209_v22 }
 0x350   :  { %v316_v25 = vmul.f32 %v748_v10, %v315_v23  ;;  %v222_v43 = vor.u32 1.1754944e-38, %v221_v38  ;;  %vm220_vm5 = vcmp.eq.f32.partialorder %v219_v40, 8.507059e+37 }
 0x351   :  { %v429_v26 = vmul.f32 %v750_v11, %v428_v24 }
 0x352   :  { %v317_v27 = vmul.f32 %v316_v25, %v310_v4 }
 0x353   :  { %v430_v28 = vmul.f32 %v429_v26, %v423_v5 }
 0x354   :  { %v752_v30 = vpop.eup %751  ;;  %v319_v31 = vsel %vm318_vm12, %v310_v4, %v317_v27 }
 0x355   :  { %v211_v33 = vmul.f32 %v752_v30, %v209_v22  ;;  %v322_v34 = vsel %vm320_vm14, %v321_v29, %v319_v31  ;;  %v432_v35 = vsel %vm431_vm13, %v423_v5, %v430_v28  ;;  %vm216_vm2 = vweird.f32 %v752_v30 }
 0x356   :  { %753 = vrcp.f32 %v322_v34  ;;  %v435_v37 = vsel %vm433_vm15, %v434_v32, %v432_v35  ;;  %vm217_vm4 = vmor %vm215_vm3, %vm216_vm2  ;;  %v334_v51 = vand.u32 2147483648, %v322_v34  ;;  %v332_v55 = vand.u32 2147483647, %v322_v34 }
 0x357   :  { %v212_v36 = vsub.f32 1.0, %v211_v33  ;;  %755 = vrcp.f32 %v435_v37  ;;  %vm328_vm7 = vweird.f32 %v322_v34  ;;  %v447_v58 = vand.u32 2147483648, %v435_v37 }
 0x358   :  { %v445_v62 = vand.u32 2147483647, %v435_v37  ;;  %v335_v63 = vor.u32 1.1754944e-38, %v334_v51  ;;  %vm333_vm10 = vcmp.eq.f32.partialorder %v332_v55, 8.507059e+37  ;;  %vm441_vm11 = vweird.f32 %v435_v37 }
 0x359   :  { %v213_v39 = vmul.f32 %v752_v30, %v212_v36  ;;  %v448_v2 = vor.u32 1.1754944e-38, %v447_v58 }
 0x35a   :  { %vm446_vm13 = vcmp.eq.f32.partialorder %v445_v62, 8.507059e+37 }
 0x35b   :  { %v214_v41 = vadd.f32 %v752_v30, %v213_v39 }
 0x35c   :  { %v754_v42 = vpop.eup %753 }
 0x35d   :  { %v218_v44 = vsel %vm217_vm4, %v752_v30, %v214_v41  ;;  %v324_v45 = vmul.f32 %v754_v42, %v322_v34  ;;  %v756_v46 = vpop.eup %755  ;;  %vm329_vm6 = vweird.f32 %v754_v42 }
 0x35e   :  { %v223_v47 = vsel %vm220_vm5, %v222_v43, %v218_v44  ;;  %v437_v50 = vmul.f32 %v756_v46, %v435_v37  ;;  %vm442_vm8 = vweird.f32 %v756_v46  ;;  %vm330_vm9 = vmor %vm328_vm7, %vm329_vm6  ;;  %vm599_vm6 = vcmask 7168  }
 0x35f   :  { %v225_v48 = vmul.f32 %v223_v47, %v897_v54  ;;  %v325_v49 = vsub.f32 1.0, %v324_v45  ;;  %vm443_vm12 = vmor %vm441_vm11, %vm442_vm8  ;;  %vm683_vm7 = vcmask 0  }
 0x360   :  { %v438_v57 = vsub.f32 1.0, %v437_v50 }
 0x361   :  { %713 = vmatpush.xpose.msk.msrb.mxu2 %vm42_vm0, %v225_v48  ;;  %v326_v52 = vmul.f32 %v754_v42, %v325_v49 }
 0x362   :  { %v439_v61 = vmul.f32 %v756_v46, %v438_v57 }
 0x363   :  { %v327_v60 = vadd.f32 %v754_v42, %v326_v52 }
 0x364   :  { %v440_v54 = vadd.f32 %v756_v46, %v439_v61 }
 0x365   :  { %v331_v0 = vsel %vm330_vm9, %v754_v42, %v327_v60 }
 0x366   :  { %v336_v1 = vsel %vm333_vm10, %v335_v63, %v331_v0  ;;  %v444_v4 = vsel %vm443_vm12, %v756_v46, %v440_v54 }
 0x367   :  { %v338_v3 = vmul.f32 %v336_v1, %v906_v59  ;;  %v449_v5 = vsel %vm446_vm13, %v448_v2, %v444_v4 }
 0x368   :  { %v451_v6 = vmul.f32 %v449_v5, %v901_v56 }
 0x369   :  { %714 = vmatmul.msk.f32.vlgmr.msrb.gmra.mxu2 %vm42_vm0, %v338_v3  ;;  %v569_v7 = vmul.f32 %v338_v3, %v225_v48 }
 0x36a   :  { %716 = vmatmul.msk.f32.vlgmr.msra.gmra.mxu3 %vm42_vm0, %v451_v6  ;;  %v639_v9 = vmul.f32 %v893_v53, %v451_v6 }
 0x36b   :  { %v570_v8 = vsel %vm42_vm0, %v569_v7, 0.0 }
 0x36c   :  { %571 = vadd.xlane.f32.xlu1 %v570_v8  ;;  %v640_v10 = vsel %vm42_vm0, %v639_v9, 0.0 }
 0x36d   :  { %641 = vadd.xlane.f32.xlu2 %v640_v10 }
 0x3df   :  { %v572_v53 = vpop.xlane.xlu1 %571 }
 0x3e0   :  { %v642_v19 = vpop.xlane.xlu2 %641  ;;  %v573_v20 = vmul.f32 10.0, %v572_v53 }
 0x3e1   :  { %v643_v21 = vmul.f32 10.0, %v642_v19 }
 0x3e2   :  { %v574_v22 = vmul.f32 1.442695, %v573_v20 }
 0x3e3   :  { %v644_v23 = vmul.f32 1.442695, %v643_v21 }
 0x3ec   :  { %v563_v11 = vpop.f32.mrf.mxu2 }
 0x3ed   :  { %v566_v59 = vmul.f32 10.0, %v563_v11  ;;  %v633_v12 = vpop.f32.mrf.mxu3 }
 0x3ee   :  { %v636_v14 = vmul.f32 10.0, %v633_v12 }
 0x3ef   :  { %v567_v13 = vmul.f32 1.442695, %v566_v59 }
 0x3f0   :  { %v637_v15 = vmul.f32 1.442695, %v636_v14 }
 0x3f1   :  { %757 = vpow2.f32 %v567_v13 }
 0x3f2   :  { %759 = vpow2.f32 %v637_v15 }
 0x3f3   :  { %761 = vpow2.f32 %v574_v22 }
 0x3f4   :  { %763 = vpow2.f32 %v644_v23 }
 0x3f7   :  { %v758_v56 = vpop.eup %757 }
 0x3f8   :  { %v576_v16 = vsel %vm112_vm1, %v758_v56, 0.0  ;;  %v760_v17 = vpop.eup %759 }
 0x3f9   :  { %577 = vadd.xlane.f32.xlu0 %v576_v16  ;;  %v646_v18 = vsel %vm112_vm1, %v760_v17, 0.0  ;;  %v762_v24 = vpop.eup %761 }
 0x3fa   :  { %647 = vadd.xlane.f32.xlu1 %v646_v18  ;;  %v764_v27 = vpop.eup %763 }
 0x46c   :  { %v578_v25 = vpop.xlane.xlu0 %577 }
 0x46d   :  { %v579_v26 = vsub.f32 %v578_v25, %v762_v24  ;;  %v648_v28 = vpop.xlane.xlu1 %647 }
 0x46e   :  { %v649_v29 = vsub.f32 %v648_v28, %v764_v27 }
 0x46f   :  { %765 = vrcp.f32 %v579_v26  ;;  %v591_v35 = vand.u32 2147483648, %v579_v26  ;;  %v589_v38 = vand.u32 2147483647, %v579_v26  ;;  %vm585_vm1 = vweird.f32 %v579_v26 }
 0x470   :  { %767 = vrcp.f32 %v649_v29  ;;  %v661_v39 = vand.u32 2147483648, %v649_v29  ;;  %v659_v41 = vand.u32 2147483647, %v649_v29  ;;  %vm655_vm2 = vweird.f32 %v649_v29 }
 0x471   :  { %v592_v43 = vor.u32 1.1754944e-38, %v591_v35  ;;  %vm590_vm3 = vcmp.eq.f32.partialorder %v589_v38, 8.507059e+37 }
 0x472   :  { %v662_v46 = vor.u32 1.1754944e-38, %v661_v39  ;;  %vm660_vm5 = vcmp.eq.f32.partialorder %v659_v41, 8.507059e+37 }
 0x475   :  { %v766_v30 = vpop.eup %765 }
 0x476   :  { %v581_v31 = vmul.f32 %v766_v30, %v579_v26  ;;  %v768_v32 = vpop.eup %767  ;;  %vm586_vm0 = vweird.f32 %v766_v30 }
 0x477   :  { %v651_v33 = vmul.f32 %v768_v32, %v649_v29  ;;  %vm656_vm14 = vweird.f32 %v768_v32  ;;  %vm587_vm15 = vmor %vm585_vm1, %vm586_vm0 }
 0x478   :  { %v582_v34 = vsub.f32 1.0, %v581_v31  ;;  %vm657_vm4 = vmor %vm655_vm2, %vm656_vm14 }
 0x479   :  { %v652_v36 = vsub.f32 1.0, %v651_v33 }
 0x47a   :  { %v583_v37 = vmul.f32 %v766_v30, %v582_v34 }
 0x47b   :  { %v653_v40 = vmul.f32 %v768_v32, %v652_v36 }
 0x47c   :  { %v584_v42 = vadd.f32 %v766_v30, %v583_v37 }
 0x47d   :  { %v654_v44 = vadd.f32 %v768_v32, %v653_v40 }
 0x47e   :  { %v588_v45 = vsel %vm587_vm15, %v766_v30, %v584_v42 }
 0x47f   :  { %v593_v47 = vsel %vm590_vm3, %v592_v43, %v588_v45  ;;  %v658_v48 = vsel %vm657_vm4, %v768_v32, %v654_v44 }
 0x480   :  { %v595_v49 = vmul.f32 %v762_v24, %v593_v47  ;;  %v663_v50 = vsel %vm660_vm5, %v662_v46, %v658_v48 }
 0x481   :  { %v665_v51 = vmul.f32 %v764_v27, %v663_v50 }
 0x482   :  { %v596_v52 = vmax.f32 %v595_v49, 0.0 }
 0x483   :  { %v666_v55 = vmax.f32 %v665_v51, 0.0 }
 0x484   :  { %769 = vlog2.f32 %v596_v52 }
 0x485   :  { %771 = vlog2.f32 %v666_v55 }
 0x48a   :  { %v770_v57 = vpop.eup %769 }
 0x48b   :  { %v598_v58 = vmul.f32 0.6931472, %v770_v57  ;;  %v772_v60 = vpop.eup %771 }
 0x48c   :  { %v668_v61 = vmul.f32 0.6931472, %v772_v60 }
 0x48d   :  { %v600_v62 = vsel %vm599_vm6, %v598_v58, 0.0 }
 0x48e   :  { %601 = vadd.xlane.f32.xlu2 %v600_v62  ;;  %v669_v63 = vsel %vm599_vm6, %v668_v61, 0.0 }
 0x48f   :  { %670 = vadd.xlane.f32.xlu0 %v669_v63 }
 0x501   :  { %v602_v0 = vpop.xlane.xlu2 %601 }
 0x502   :  { %v603_v54 = vrot.slane %v602_v0, 4  ;;  %v671_v1 = vpop.xlane.xlu0 %670 }
 0x503   :  { %v672_v3 = vrot.slane %v671_v1, 4 }
 0x504   :  { %v604_v2 = vadd.f32 %v603_v54, %v602_v0 }
 0x505   :  { %v673_v5 = vadd.f32 %v672_v3, %v671_v1 }
 0x506   :  { %v605_v4 = vrot.slane %v604_v2, 2 }
 0x507   :  { %v674_v6 = vrot.slane %v673_v5, 2 }
 0x508   :  { %v606_v7 = vadd.f32 %v605_v4, %v604_v2 }
 0x509   :  { %v675_v8 = vadd.f32 %v674_v6, %v673_v5 }
 0x50a   :  { %v607_v9 = vrot.slane %v606_v7, 1 }
 0x50b   :  { %v676_v11 = vrot.slane %v675_v8, 1 }
 0x50c   :  { %v608_v10 = vadd.f32 %v607_v9, %v606_v7 }
 0x50d   :  { %v677_v59 = vadd.f32 %v676_v11, %v675_v8 }
 0x50e   :  { %717 = vpush %v608_v10 }
 0x50f   :  { %719 = vpush %v677_v59 }
 0x53f   :  { %s718_s0 = spop %717 }
 0x540   :  { %s720_s1 = spop %719 }
 0x541   :  { %s679_s19 = sadd.f32 %s720_s1, %s718_s0 }
 0x543   :  { %s680_s22 = ssub.f32 0.0, %s679_s19 }
 0x545   :  { %s681_s26 = smul.f32 0.125, %s680_s22 }
 0x547   :  { %v682_v12 = vstv %s681_s26 }
 0x548   :  { %684 = vst.msk [vmem:[#allocation7] sm:$0x1] %vm683_vm7, %v682_v12 }
 0x549   :  { %695 = dma.vmem_to_hbm [thread:$0]  %s691_s21, 16, %s693_s25, [#allocation4]  }
 0x54a   :  { %849 = dma.done.wait [#allocation4], 16  }
 0x54b   :  { %850 = vsyncadd [#allocation4], 4294967280 }
 0x54c   :  { %700 = vsyncpa [#allocation3], 1 }
 0x54d   :  { %701 = vsyncpa [#allocation6], 1 }
 0x54e   :  { %702 = vsyncpa [#allocation4], 1 }

</bundles_post_ra>
